<compile_context>
chip_gen: v5e
topology: v5e:2x2
jax: 0.10.0
libtpu: 0.0.40
codegen_flags: <defaults>
</compile_context>

<pallas_src>
import jax
import jax.numpy as jnp
from jax.experimental import pallas as pl
from jax.experimental.pallas import tpu as pltpu


def _round_up(x, m):
    return ((x + m - 1) // m) * m


def time_embedding_kernel(t_ref, w1_ref, b1_ref, w2_ref, b2_ref, o_ref):
    # Two MXU matmuls (bf16 operands, f32 accumulation) + f32 SiLU, fused in VMEM.
    t = t_ref[...].astype(w1_ref.dtype)
    h = jnp.dot(t, w1_ref[...], preferred_element_type=jnp.float32) + b1_ref[...]
    h = h * jax.nn.sigmoid(h)  # SiLU kept in f32 (EUP sigmoid + VPU mul)
    y = jnp.dot(h.astype(w2_ref.dtype), w2_ref[...],
                preferred_element_type=jnp.float32) + b2_ref[...]
    o_ref[...] = y.astype(o_ref.dtype)


def time_embedding(t, w1, b1, w2, b2, *, batch_tile=None, compute_dtype=jnp.bfloat16):
    """y = silu(t @ w1 + b1) @ w2 + b2 (torch Linear semantics, weights pre-transposed)."""
    B, dim_t = t.shape
    emb_dim = w1.shape[1]

    # Lane-dense padded output / hidden width (multiple of 128).
    N = _round_up(emb_dim, 128)

    # Batch tile: multiple of 8 sublanes; prefer grid >= 2 (pipelining + v7x's 2 TCs),
    # cap at 512 rows.
    if batch_tile is None:
        if B <= 8:
            batch_tile = 8
        else:
            batch_tile = min(512, max(8, _round_up(pl.cdiv(B, 2), 8)))
    batch_tile = max(8, _round_up(batch_tile, 8))
    B_pad = _round_up(B, batch_tile)

    # Pad / cast parameters once in the wrapper.  Zero padding is exact:
    # silu(0 + 0) = 0, and padded W2 rows/cols are zero, so padded output lanes are 0.
    w1_p = jnp.zeros((dim_t, N), compute_dtype).at[:, :emb_dim].set(w1.astype(compute_dtype))
    w2_p = jnp.zeros((N, N), compute_dtype).at[:emb_dim, :emb_dim].set(w2.astype(compute_dtype))
    b1_p = jnp.zeros((1, N), jnp.float32).at[:, :emb_dim].set(b1.reshape(1, emb_dim).astype(jnp.float32))
    b2_p = jnp.zeros((1, N), jnp.float32).at[:, :emb_dim].set(b2.reshape(1, emb_dim).astype(jnp.float32))
    t_p = t if B_pad == B else jnp.pad(t, ((0, B_pad - B), (0, 0)))

    grid = (B_pad // batch_tile,)

    # VMEM budget: double-buffered t/out tiles + resident weights/biases + slack.
    # (On v7x one could additionally mark the constant-index W1/W2 specs with
    #  pipeline_mode=pl.Buffered(1) to avoid double-buffering them; left at the
    #  default here for portability across generations.)
    wsize = jnp.dtype(compute_dtype).itemsize
    vmem_bytes = (2 * (batch_tile * dim_t * t.dtype.itemsize   # t tile
                       + batch_tile * N * 4                    # out tile (f32)
                       + dim_t * N * wsize                     # W1
                       + N * N * wsize                         # W2
                       + 2 * N * 4)                            # biases
                  + (4 << 20))                                 # slack
    vmem_bytes = int(min(max(vmem_bytes, 32 << 20), 100 << 20))

    cost = pl.CostEstimate(
        flops=2 * B_pad * dim_t * N + 2 * B_pad * N * N,
        transcendentals=B_pad * N,
        bytes_accessed=(t_p.size * t_p.dtype.itemsize
                        + w1_p.size * wsize + w2_p.size * wsize
                        + 2 * N * 4
                        + B_pad * N * 4),
    )

    out = pl.pallas_call(
        time_embedding_kernel,
        out_shape=jax.ShapeDtypeStruct((B_pad, N), jnp.float32),
        grid_spec=pltpu.PrefetchScalarGridSpec(
            num_scalar_prefetch=0,
            grid=grid,
            in_specs=[
                pl.BlockSpec((batch_tile, dim_t), lambda i: (i, 0)),  # t tile (pipelined)
                pl.BlockSpec((dim_t, N), lambda i: (0, 0)),           # W1 (resident)
                pl.BlockSpec((1, N), lambda i: (0, 0)),               # b1 (resident)
                pl.BlockSpec((N, N), lambda i: (0, 0)),               # W2 (resident)
                pl.BlockSpec((1, N), lambda i: (0, 0)),               # b2 (resident)
            ],
            out_specs=pl.BlockSpec((batch_tile, N), lambda i: (i, 0)),  # lane-dense store
        ),
        compiler_params=pltpu.CompilerParams(
            dimension_semantics=("parallel",),
            vmem_limit_bytes=vmem_bytes,
        ),
        cost_estimate=cost,
    )(t_p, w1_p, b1_p, w2_p, b2_p)

    # Strip batch / lane padding outside the kernel.
    return out[:B, :emb_dim]


def reference_f32(t, w1, b1, w2, b2):
    h = t @ w1 + b1
    h = h * jax.nn.sigmoid(h)
    return h @ w2 + b2


def reference_matched(t, w1, b1, w2, b2, compute_dtype=jnp.bfloat16):
    # Mirrors the kernel's precision: bf16 dot operands, f32 accumulation & SiLU.
    h = jnp.dot(t.astype(compute_dtype), w1.astype(compute_dtype),
                preferred_element_type=jnp.float32) + b1
    h = h * jax.nn.sigmoid(h)
    return jnp.dot(h.astype(compute_dtype), w2.astype(compute_dtype),
                   preferred_element_type=jnp.float32) + b2


if __name__ == "__main__":
    # Small shapes consistent with the module: dim_timesteps=32, emb_dim=64, batch=8.
    B, dim_timesteps, emb_dim = 8, 32, 64

    key = jax.random.PRNGKey(0)
    k_t, k_w1, k_b1, k_w2, k_b2 = jax.random.split(key, 5)

    t = jax.random.normal(k_t, (B, dim_timesteps), dtype=jnp.float32)

    # PyTorch Linear weights, stored pre-transposed for y = x @ W + b.
    w1 = jax.random.normal(k_w1, (dim_timesteps, emb_dim), dtype=jnp.float32) / jnp.sqrt(dim_timesteps)
    b1 = jax.random.normal(k_b1, (1, emb_dim), dtype=jnp.float32) * 0.01
    w2 = jax.random.normal(k_w2, (emb_dim, emb_dim), dtype=jnp.float32) / jnp.sqrt(emb_dim)
    b2 = jax.random.normal(k_b2, (1, emb_dim), dtype=jnp.float32) * 0.01

    out = time_embedding(t, w1, b1, w2, b2)
    out = jax.block_until_ready(out)
    assert out.shape == (B, emb_dim)

    # Exact check against a matched-precision (bf16 operand / f32 accum) reference.
    ref_m = reference_matched(t, w1, b1, w2, b2)
    assert jnp.allclose(out, ref_m, atol=1e-4, rtol=1e-4), "mismatch vs matched-precision reference"

    # Loose sanity check against the full-f32 reference (bf16 operand rounding only).
    ref_f = reference_f32(t, w1, b1, w2, b2)
    assert jnp.allclose(out, ref_f, atol=1e-1, rtol=1e-1), "mismatch vs f32 reference"

    print("KERNEL_OK")
</pallas_src>

<mosaic_0001>
module attributes {stable_mosaic.version = 11 : i64} {
  func.func @time_embedding_kernel(%arg0: i32, %arg1: memref<8x32xf32, #tpu.memory_space<vmem>>, %arg2: memref<32x128xbf16, #tpu.memory_space<vmem>>, %arg3: memref<1x128xf32, #tpu.memory_space<vmem>>, %arg4: memref<128x128xbf16, #tpu.memory_space<vmem>>, %arg5: memref<1x128xf32, #tpu.memory_space<vmem>>, %arg6: memref<8x128xf32, #tpu.memory_space<vmem>>) attributes {dimension_semantics = [#tpu.dimension_semantics<parallel>], iteration_bounds = array<i64: 1>, scalar_prefetch = 0 : i64, scratch_operands = 0 : i64, tpu.core_type = #tpu.core_type<tc>, window_params = [{transform_indices = @transform_0, window_bounds = array<i64: 8, 32>}, {pipeline_mode = #tpu.pipeline_mode<synchronous>, transform_indices = @transform_1, window_bounds = array<i64: 32, 128>}, {pipeline_mode = #tpu.pipeline_mode<synchronous>, transform_indices = @transform_2, window_bounds = array<i64: 1, 128>}, {pipeline_mode = #tpu.pipeline_mode<synchronous>, transform_indices = @transform_3, window_bounds = array<i64: 128, 128>}, {pipeline_mode = #tpu.pipeline_mode<synchronous>, transform_indices = @transform_4, window_bounds = array<i64: 1, 128>}, {transform_indices = @transform_5, window_bounds = array<i64: 8, 128>}]} {
    %c0 = arith.constant 0 : index
    %c0_0 = arith.constant 0 : index
    %0 = vector.load %arg1[%c0, %c0_0] : memref<8x32xf32, #tpu.memory_space<vmem>>, vector<8x32xf32>
    %1 = arith.truncf %0 : vector<8x32xf32> to vector<8x32xbf16>
    %c0_1 = arith.constant 0 : index
    %c0_2 = arith.constant 0 : index
    %2 = vector.load %arg2[%c0_1, %c0_2] : memref<32x128xbf16, #tpu.memory_space<vmem>>, vector<32x128xbf16>
    %cst = arith.constant dense<0.000000e+00> : vector<8x128xf32>
    %3 = tpu.matmul %1, %2, %cst {dimension_numbers = #tpu.dot_dimension_numbers<[1], [0], [0], [1], [0, 0, 1, 1], [], []>} : vector<8x32xbf16>, vector<32x128xbf16>, vector<8x128xf32> -> vector<8x128xf32>
    %c0_3 = arith.constant 0 : index
    %c0_4 = arith.constant 0 : index
    %4 = vector.load %arg3[%c0_3, %c0_4] : memref<1x128xf32, #tpu.memory_space<vmem>>, vector<1x128xf32>
    %5 = vector.broadcast %4 : vector<1x128xf32> to vector<8x128xf32>
    %6 = arith.addf %3, %5 : vector<8x128xf32>
    %7 = arith.negf %6 : vector<8x128xf32>
    %8 = math.exp %7 : vector<8x128xf32>
    %cst_5 = arith.constant 1.000000e+00 : f32
    %9 = vector.broadcast %cst_5 : f32 to vector<8x128xf32>
    %10 = arith.addf %9, %8 : vector<8x128xf32>
    %11 = arith.divf %9, %10 : vector<8x128xf32>
    %12 = arith.mulf %6, %11 : vector<8x128xf32>
    %13 = arith.truncf %12 : vector<8x128xf32> to vector<8x128xbf16>
    %c0_6 = arith.constant 0 : index
    %c0_7 = arith.constant 0 : index
    %14 = vector.load %arg4[%c0_6, %c0_7] : memref<128x128xbf16, #tpu.memory_space<vmem>>, vector<128x128xbf16>
    %cst_8 = arith.constant dense<0.000000e+00> : vector<8x128xf32>
    %15 = tpu.matmul %13, %14, %cst_8 {dimension_numbers = #tpu.dot_dimension_numbers<[1], [0], [0], [1], [0, 0, 1, 1], [], []>} : vector<8x128xbf16>, vector<128x128xbf16>, vector<8x128xf32> -> vector<8x128xf32>
    %c0_9 = arith.constant 0 : index
    %c0_10 = arith.constant 0 : index
    %16 = vector.load %arg5[%c0_9, %c0_10] : memref<1x128xf32, #tpu.memory_space<vmem>>, vector<1x128xf32>
    %17 = vector.broadcast %16 : vector<1x128xf32> to vector<8x128xf32>
    %18 = arith.addf %15, %17 : vector<8x128xf32>
    %c0_11 = arith.constant 0 : index
    %c0_12 = arith.constant 0 : index
    %19 = vector.load %arg6[%c0_11, %c0_12] : memref<8x128xf32, #tpu.memory_space<vmem>>, vector<8x128xf32>
    tpu.vector_store %arg6[%c0_11, %c0_12], %18 {strides = array<i32>} : memref<8x128xf32, #tpu.memory_space<vmem>>, vector<8x128xf32>,
    return
  }
  func.func @transform_0(%arg0: i32) -> (i32, i32) {
    %c0_i32 = arith.constant 0 : i32
    %c0_i32_0 = arith.constant 0 : i32
    return %arg0, %c0_i32 : i32, i32
  }
  func.func @transform_1(%arg0: i32) -> (i32, i32) {
    %c0_i32 = arith.constant 0 : i32
    %c0_i32_0 = arith.constant 0 : i32
    %c0_i32_1 = arith.constant 0 : i32
    return %c0_i32, %c0_i32_0 : i32, i32
  }
  func.func @transform_2(%arg0: i32) -> (i32, i32) {
    %c0_i32 = arith.constant 0 : i32
    %c0_i32_0 = arith.constant 0 : i32
    %c0_i32_1 = arith.constant 0 : i32
    return %c0_i32, %c0_i32_0 : i32, i32
  }
  func.func @transform_3(%arg0: i32) -> (i32, i32) {
    %c0_i32 = arith.constant 0 : i32
    %c0_i32_0 = arith.constant 0 : i32
    %c0_i32_1 = arith.constant 0 : i32
    return %c0_i32, %c0_i32_0 : i32, i32
  }
  func.func @transform_4(%arg0: i32) -> (i32, i32) {
    %c0_i32 = arith.constant 0 : i32
    %c0_i32_0 = arith.constant 0 : i32
    %c0_i32_1 = arith.constant 0 : i32
    return %c0_i32, %c0_i32_0 : i32, i32
  }
  func.func @transform_5(%arg0: i32) -> (i32, i32) {
    %c0_i32 = arith.constant 0 : i32
    %c0_i32_0 = arith.constant 0 : i32
    return %arg0, %c0_i32 : i32, i32
  }
}

</mosaic_0001>

<bundles_post_ra>
// kernel: tpu_custom_call.1
= control target key start
LH: loop header
LB: loop body
LE: loop exit
PB: predicated region body
PF: predicated region fallthrough
CT: control target
= control target key end

     0   :  { %10 = vsyncpa [#allocation3], 0  ;;  %s447_s0 = inlined_call_operand.hbm [shape: f32[8,32], index: 0, kind: input, shape index: {}]   ;;  %s448_s1 = inlined_call_operand.hbm [shape: bf16[32,128], index: 1, kind: input, shape index: {}]   ;;  %s449_s2 = inlined_call_operand.vmem [shape: f32[1,128], index: 2, kind: input, shape index: {}]   ;;  %s450_s3 = inlined_call_operand.hbm [shape: bf16[128,128], index: 3, kind: input, shape index: {}]   ;;  %s451_s4 = inlined_call_operand.vmem [shape: f32[1,128], index: 4, kind: input, shape index: {}]   ;;  %s452_s5 = inlined_call_operand.hbm [shape: f32[8,128], index: 5, kind: output, shape index: {}]  }
   0x1   :  { %11 = vsyncpa [#allocation6], 0  ;;  %s28_s20 = sshll.u32 %s448_s1, 4  ;;  %s29_s20 = int_to_ptr.hbm [resolvable:$true] %s28_s20 }
   0x2   :  { %12 = vsyncpa [#allocation4], 0  ;;  %s393_s21 = smov [#allocation5]   ;;  %s18_s25 = sshll.u32 %s447_s0, 4  ;;  %s19_s25 = int_to_ptr.hbm [resolvable:$true] %s18_s25 }
   0x3   :  { %s30_s22 = sshll.u32 %s393_s21, 4  ;;  %s394_s26 = smov 64   ;;  %s31_s22 = int_to_ptr.vmem [resolvable:$true] %s30_s22 }
   0x4   :  { %s395_s27 = smov 4   ;;  %s396_s28 = smov [#allocation2]  }
   0x5   :  { %36 = dma.hbm_to_vmem [thread:$0]  %s29_s20, 256, %s31_s22, [#allocation6], %s394_s26, %s394_s26, %s395_s27  }
   0x6   :  { %s20_s29 = sshll.u32 %s396_s28, 4  ;;  %s43_s7 = sshll.u32 %s450_s3, 4  ;;  %s21_s29 = int_to_ptr.vmem [resolvable:$true] %s20_s29  ;;  %s44_s7 = int_to_ptr.hbm [resolvable:$true] %s43_s7 }
   0x7   :  { %23 = dma.hbm_to_vmem [thread:$0]  %s19_s25, 128, %s21_s29, [#allocation3]  }
   0x8   :  { %s397_s1 = smov [#allocation7]  }
   0x9   :  { %s45_s8 = sshll.u32 %s397_s1, 4  ;;  %s46_s8 = int_to_ptr.vmem [resolvable:$true] %s45_s8 }
   0xa   :  { %51 = dma.hbm_to_vmem [thread:$0]  %s44_s7, 1024, %s46_s8, [#allocation6], %s394_s26, %s394_s26, %s395_s27  }
   0xb   :  { %387 = dma.done.wait [#allocation3], 128  }
   0xc   :  { %388 = vsyncadd [#allocation3], 4294967168 }
   0xd   :  { %389 = dma.done.wait [#allocation6], 1280  }
   0xe   :  { %390 = vsyncadd [#allocation6], 4294966016  ;;  %v270_v0 = vld [vmem:[#allocation5 + $0x8] sm:$0xff]  ;;  %v269_v1 = vld [vmem:[#allocation5] sm:$0xff]  ;;  %vm89_vm0 = vcmask 261120   ;;  %s398_s10 = smov [#allocation8]  }
   0xf   :  { %99 = vmatpush.bf16.msra.mxu0 %v270_v0  ;;  %v67_v2 = vld [vmem:[#allocation2] sm:$0xff]  ;;  %v278_v4 = vld [vmem:[#allocation7 + $0x38] sm:$0xff]  ;;  %v277_v5 = vld [vmem:[#allocation7 + $0x30] sm:$0xff]  ;;  %s214_s11 = sshll.u32 %s398_s10, 4  ;;  %s216_s14 = sshll.u32 %s452_s5, 4  ;;  %s215_s11 = int_to_ptr.vmem [resolvable:$true] %s214_s11  ;;  %s217_s14 = int_to_ptr.hbm [resolvable:$true] %s216_s14 }
  0x10   :  { %v68_v3 = vpack.c.bf16 %v67_v2, %v67_v2  ;;  %195 = vmatpush.bf16.msra.mxu1 %v278_v4  ;;  %v276_v6 = vld [vmem:[#allocation7 + $0x28] sm:$0xff]  ;;  %v275_v7 = vld [vmem:[#allocation7 + $0x20] sm:$0xff]  ;;  %v274_v8 = vld [vmem:[#allocation7 + $0x18] sm:$0xff] }
  0x11   :  { %v273_v9 = vld [vmem:[#allocation7 + $0x10] sm:$0xff]  ;;  %v272_v10 = vld [vmem:[#allocation7 + $0x8] sm:$0xff]  ;;  %v271_v11 = vld [vmem:[#allocation7] sm:$0xff] }
  0x12   :  { %v285_v12 = vld [vmem:[%s449_s2] ss:$0 sm:$0xff] }
  0x13   :  { %100 = vmatpush.bf16.msra.mxu0 %v269_v1  ;;  %v286_v31 = vld [vmem:[%s451_s4] ss:$0 sm:$0xff] }
  0x14   :  { %196 = vmatpush.bf16.msra.mxu1 %v277_v5 }
  0x16   :  { %235 = vmatmul.msk.bf16.vlgmr.msra.gmra.mxu0 %vm89_vm0, %v68_v3 }
  0x18   :  { %197 = vmatpush.bf16.msra.mxu1 %v276_v6 }
  0x1c   :  { %198 = vmatpush.bf16.msra.mxu1 %v275_v7 }
  0x20   :  { %199 = vmatpush.bf16.msra.mxu1 %v274_v8 }
  0x24   :  { %200 = vmatpush.bf16.msra.mxu1 %v273_v9 }
  0x28   :  { %201 = vmatpush.bf16.msra.mxu1 %v272_v10 }
  0x2c   :  { %202 = vmatpush.bf16.msra.mxu1 %v271_v11 }
  0x93   :  { %v102_v13 = vpop.f32.mrf.mxu0 }
  0x94   :  { %v103_v14 = vadd.f32 %v285_v12, %v102_v13 }
  0x96   :  { %v236_v15 = vmul.f32 -1.442695, %v103_v14 }
  0x98   :  { %287 = vpow2.f32 %v236_v15 }
  0x9b   :  { %v104_v16 = vpop.f32.mrf.mxu0 }
  0x9e   :  { %v288_v17 = vpop.eup %287 }
  0x9f   :  { %v109_v18 = vadd.f32 1.0, %v288_v17 }
  0xa1   :  { %289 = vrcp.f32 %v109_v18  ;;  %v121_v22 = vand.u32 2147483648, %v109_v18  ;;  %v119_v24 = vand.u32 2147483647, %v109_v18  ;;  %vm115_vm2 = vweird.f32 %v109_v18 }
  0xa3   :  { %v122_v26 = vor.u32 1.1754944e-38, %v121_v22  ;;  %vm120_vm4 = vcmp.eq.f32.partialorder %v119_v24, 8.507059e+37 }
  0xa7   :  { %v290_v19 = vpop.eup %289 }
  0xa8   :  { %v111_v20 = vmul.f32 %v290_v19, %v109_v18  ;;  %vm116_vm1 = vweird.f32 %v290_v19 }
  0xa9   :  { %vm117_vm3 = vmor %vm115_vm2, %vm116_vm1 }
  0xaa   :  { %v112_v21 = vsub.f32 1.0, %v111_v20 }
  0xac   :  { %v113_v23 = vmul.f32 %v290_v19, %v112_v21 }
  0xae   :  { %v114_v25 = vadd.f32 %v290_v19, %v113_v23 }
  0xb0   :  { %v118_v27 = vsel %vm117_vm3, %v290_v19, %v114_v25 }
  0xb1   :  { %v123_v28 = vsel %vm120_vm4, %v122_v26, %v118_v27 }
  0xb2   :  { %v125_v29 = vmul.f32 %v123_v28, %v103_v14 }
  0xb4   :  { %v126_v30 = vpack.c.bf16 %v125_v29, %v125_v29 }
  0xb6   :  { %203 = vmatmul.bf16.vlgmr.msra.gmra.mxu1 %v126_v30 }
 0x133   :  { %v204_v32 = vpop.f32.mrf.mxu1 }
 0x134   :  { %v205_v33 = vadd.f32 %v286_v31, %v204_v32 }
 0x136   :  { %208 = vst [vmem:[#allocation8] sm:$0xff] %v205_v33 }
 0x137   :  { %219 = dma.vmem_to_hbm [thread:$0]  %s215_s11, 128, %s217_s14, [#allocation4]  }
 0x13b   :  { %v206_v34 = vpop.f32.mrf.mxu1 }
 0x13c   :  { %391 = dma.done.wait [#allocation4], 128  }
 0x13d   :  { %392 = vsyncadd [#allocation4], 4294967168 }
 0x13e   :  { %224 = vsyncpa [#allocation3], 1 }
 0x13f   :  { %225 = vsyncpa [#allocation6], 1 }
 0x140   :  { %226 = vsyncpa [#allocation4], 1 }

</bundles_post_ra>
